<compile_context>
chip_gen: v7x
topology: tpu7x:2x2x1
jax: 0.10.0
libtpu: 0.0.40
codegen_flags: <defaults>
</compile_context>

<pallas_src>
import jax
import jax.numpy as jnp
from jax import lax
from jax.experimental import pallas as pl
from jax.experimental.pallas import tpu as pltpu

# ---- problem sizes (small, consistent with the module) ----
BATCH = 2
SEQ = 8
D_MODEL = 32
HEADS = 4
DIM_HIDDEN_FC = 64
DH = D_MODEL // HEADS          # 8
LN_EPS = 1e-5
LEAKY_SLOPE = 0.01             # nn.LeakyReLU default negative_slope

# SEQ, DH, BATCH and BATCH*SEQ are powers of two -> masks can be built with
# cheap shift/and bit ops on iotas instead of integer div/mod.
LOG2_S = 3                     # SEQ == 8
LOG2_DH = 3                    # DH == 8
LOG2_BS = 4                    # BATCH * SEQ == 16


def _layer_norm(x, w, b):
    mu = jnp.mean(x, axis=-1, keepdims=True)
    var = jnp.mean((x - mu) ** 2, axis=-1, keepdims=True)
    return (x - mu) * lax.rsqrt(var + LN_EPS) * w + b


def encoder_layer_kernel(xin_ref, wqkv_ref, bqkv_ref, wo_ref, bo_ref,
                         ln1w_ref, ln1b_ref, w1_ref, w2_ref,
                         ln2w_ref, ln2b_ref,
                         out_ref, attn_ref):
    f32 = jnp.float32
    N = BATCH * SEQ            # 16 rows per activation tensor (batch*seq)
    M = HEADS * BATCH * SEQ    # 64 block-expanded key/value rows

    xin = xin_ref[...]                                   # (2N, F): [src ; key]

    # ---- fused Q/K/V projection: one MXU push + one bias add ----
    qkv = jnp.dot(xin, wqkv_ref[...], preferred_element_type=f32) + bqkv_ref[...]
    q = qkv[0:N, 0:D_MODEL]                              # src @ wq + bq
    k = qkv[N:2 * N, D_MODEL:2 * D_MODEL]                # key @ wk + bk
    v = qkv[N:2 * N, 2 * D_MODEL:3 * D_MODEL]            # key @ wv + bv

    # ---- attention over all (batch, head) pairs with a few 2-D matmuls ----
    # expanded row index r = h*(BATCH*SEQ) + b'*SEQ + j
    r_mf = lax.broadcasted_iota(jnp.int32, (M, D_MODEL), 0)
    f_mf = lax.broadcasted_iota(jnp.int32, (M, D_MODEL), 1)
    head_mask = jnp.where((r_mf >> LOG2_BS) == (f_mf >> LOG2_DH), 1.0, 0.0)

    k_exp = jnp.concatenate([k] * HEADS, axis=0) * head_mask     # (M, F)
    v_exp = jnp.concatenate([v] * HEADS, axis=0) * head_mask     # (M, F)

    # scores[n, r] = <q[n, head(r) feats], k[row(r), head(r) feats]>
    scores = lax.dot_general(q, k_exp, (((1,), (1,)), ((), ())),
                             preferred_element_type=f32)         # (N, M)
    scores = scores * (1.0 / (float(DH) ** 0.5))

    # mask out cross-batch (query batch != key batch) columns
    n_nm = lax.broadcasted_iota(jnp.int32, (N, M), 0)
    r_nm = lax.broadcasted_iota(jnp.int32, (N, M), 1)
    bmask = jnp.where((n_nm >> LOG2_S) == ((r_nm >> LOG2_S) & (BATCH - 1)),
                      1.0, 0.0)                                  # (N, M)

    m = jnp.max(scores, axis=-1, keepdims=True)   # any per-row constant is valid
    e = jnp.exp(scores - m) * bmask

    # per-(head, batch) block softmax denominator, broadcast back via matmul
    r_mm = lax.broadcasted_iota(jnp.int32, (M, M), 0)
    c_mm = lax.broadcasted_iota(jnp.int32, (M, M), 1)
    block_ones = jnp.where((r_mm >> LOG2_S) == (c_mm >> LOG2_S), 1.0, 0.0)
    denom = jnp.dot(e, block_ones, preferred_element_type=f32)   # (N, M)
    # masked-out blocks have denom == 0; bias them to 1 so p stays exactly 0 there
    p = e * pl.reciprocal(denom + (1.0 - bmask), approx=True)

    # context: each head's probabilities hit their own feature slots of v_exp
    ctx = jnp.dot(p, v_exp, preferred_element_type=f32)          # (N, F)

    # head-averaged attention weights (cross-batch entries of p are exactly 0)
    r_ms = lax.broadcasted_iota(jnp.int32, (M, SEQ), 0)
    c_ms = lax.broadcasted_iota(jnp.int32, (M, SEQ), 1)
    sum_mat = jnp.where((r_ms & (SEQ - 1)) == c_ms, 1.0, 0.0)    # (M, S)
    attn_ref[...] = jnp.dot(p, sum_mat, preferred_element_type=f32) * (1.0 / HEADS)

    # ---- output projection + residual + LayerNorm1 (dropout1 = identity) ----
    src2 = jnp.dot(ctx, wo_ref[...], preferred_element_type=f32) + bo_ref[...]
    x = _layer_norm(xin[0:N, :] + src2, ln1w_ref[...], ln1b_ref[...])

    # ---- FFN: Linear(no bias) -> LeakyReLU -> Dropout(identity) -> Linear ----
    h1 = jnp.dot(x, w1_ref[...], preferred_element_type=f32)
    h1 = jnp.where(h1 >= 0, h1, LEAKY_SLOPE * h1)
    ff = jnp.dot(h1, w2_ref[...], preferred_element_type=f32)

    # ---- residual + LayerNorm2 (dropout2 = identity) ----
    out_ref[...] = _layer_norm(x + ff, ln2w_ref[...], ln2b_ref[...])


def transformer_encoder_layer(src, key_in, params):
    B, S, F = src.shape
    N = B * S
    # Wrapper-side (one-time, XLA) prep: stack [src; key] and fuse wq|wk|wv so
    # the kernel does all projections in a single lane-wide matmul.
    xin = jnp.concatenate([src.reshape(N, F), key_in.reshape(N, F)], axis=0)
    wqkv = jnp.concatenate([params["wq"], params["wk"], params["wv"]], axis=1)
    bqkv = jnp.concatenate([params["bq"], params["bk"], params["bv"]], axis=1)

    vmem = pl.BlockSpec(memory_space=pltpu.MemorySpace.VMEM)
    out2d, attn2d = pl.pallas_call(
        encoder_layer_kernel,
        out_shape=(jax.ShapeDtypeStruct((N, F), jnp.float32),
                   jax.ShapeDtypeStruct((N, S), jnp.float32)),
        in_specs=[vmem] * 11,
        out_specs=(vmem, vmem),
    )(xin, wqkv, bqkv,
      params["wo"], params["bo"],
      params["ln1_w"], params["ln1_b"],
      params["w1"], params["w2"],
      params["ln2_w"], params["ln2_b"])
    return out2d.reshape(B, S, F), attn2d.reshape(B, S, S)


def reference_forward(src, key_in, params):
    """Pure-JAX reference for verification (same math as the kernel)."""
    B, S, F = src.shape
    dh = F // HEADS
    q = src @ params["wq"] + params["bq"]
    k = key_in @ params["wk"] + params["bk"]
    v = key_in @ params["wv"] + params["bv"]
    qh = q.reshape(B, S, HEADS, dh).transpose(0, 2, 1, 3)
    kh = k.reshape(B, S, HEADS, dh).transpose(0, 2, 1, 3)
    vh = v.reshape(B, S, HEADS, dh).transpose(0, 2, 1, 3)
    scores = jnp.einsum("bhqd,bhkd->bhqk", qh, kh) / jnp.sqrt(jnp.float32(dh))
    p = jax.nn.softmax(scores, axis=-1)
    attn_w = jnp.mean(p, axis=1)
    ctx = jnp.einsum("bhqk,bhkd->bhqd", p, vh).transpose(0, 2, 1, 3).reshape(B, S, F)
    src2 = ctx @ params["wo"] + params["bo"]

    x = _layer_norm(src + src2, params["ln1_w"], params["ln1_b"])
    h1 = x @ params["w1"]
    h1 = jnp.where(h1 >= 0, h1, LEAKY_SLOPE * h1)
    ff = h1 @ params["w2"]
    out = _layer_norm(x + ff, params["ln2_w"], params["ln2_b"])
    return out, attn_w


def init_params(key):
    ks = jax.random.split(key, 8)
    s = 0.1
    return {
        "wq": s * jax.random.normal(ks[0], (D_MODEL, D_MODEL), jnp.float32),
        "bq": s * jax.random.normal(ks[1], (1, D_MODEL), jnp.float32),
        "wk": s * jax.random.normal(ks[2], (D_MODEL, D_MODEL), jnp.float32),
        "bk": s * jax.random.normal(ks[3], (1, D_MODEL), jnp.float32),
        "wv": s * jax.random.normal(ks[4], (D_MODEL, D_MODEL), jnp.float32),
        "bv": s * jax.random.normal(ks[5], (1, D_MODEL), jnp.float32),
        "wo": s * jax.random.normal(ks[6], (D_MODEL, D_MODEL), jnp.float32),
        "bo": s * jax.random.normal(ks[7], (1, D_MODEL), jnp.float32),
        "ln1_w": jnp.ones((1, D_MODEL), jnp.float32),
        "ln1_b": jnp.zeros((1, D_MODEL), jnp.float32),
        "w1": s * jax.random.normal(jax.random.PRNGKey(100), (D_MODEL, DIM_HIDDEN_FC), jnp.float32),
        "w2": s * jax.random.normal(jax.random.PRNGKey(101), (DIM_HIDDEN_FC, D_MODEL), jnp.float32),
        "ln2_w": jnp.ones((1, D_MODEL), jnp.float32),
        "ln2_b": jnp.zeros((1, D_MODEL), jnp.float32),
    }


if __name__ == "__main__":
    root = jax.random.PRNGKey(0)
    k_src, k_key, k_params = jax.random.split(root, 3)
    src = jax.random.normal(k_src, (BATCH, SEQ, D_MODEL), jnp.float32)
    key_in = jax.random.normal(k_key, (BATCH, SEQ, D_MODEL), jnp.float32)
    params = init_params(k_params)

    out, attn_w = transformer_encoder_layer(src, key_in, params)
    out = jax.block_until_ready(out)
    attn_w = jax.block_until_ready(attn_w)

    ref_out, ref_attn = reference_forward(src, key_in, params)
    assert out.shape == (BATCH, SEQ, D_MODEL)
    assert attn_w.shape == (BATCH, SEQ, SEQ)
    # Tolerance slightly looser than f32-exact because the softmax denominator
    # uses the EUP approximate reciprocal (pl.reciprocal(..., approx=True)).
    assert jnp.allclose(out, ref_out, atol=2e-3, rtol=2e-3)
    assert jnp.allclose(attn_w, ref_attn, atol=2e-3, rtol=2e-3)

    print("KERNEL_OK")
</pallas_src>

<mosaic_0001>
module attributes {stable_mosaic.version = 11 : i64} {
  func.func @encoder_layer_kernel(%arg0: memref<32x32xf32, #tpu.memory_space<vmem>>, %arg1: memref<32x96xf32, #tpu.memory_space<vmem>>, %arg2: memref<1x96xf32, #tpu.memory_space<vmem>>, %arg3: memref<32x32xf32, #tpu.memory_space<vmem>>, %arg4: memref<1x32xf32, #tpu.memory_space<vmem>>, %arg5: memref<1x32xf32, #tpu.memory_space<vmem>>, %arg6: memref<1x32xf32, #tpu.memory_space<vmem>>, %arg7: memref<32x64xf32, #tpu.memory_space<vmem>>, %arg8: memref<64x32xf32, #tpu.memory_space<vmem>>, %arg9: memref<1x32xf32, #tpu.memory_space<vmem>>, %arg10: memref<1x32xf32, #tpu.memory_space<vmem>>, %arg11: memref<16x32xf32, #tpu.memory_space<vmem>>, %arg12: memref<16x8xf32, #tpu.memory_space<vmem>>) attributes {dimension_semantics = [], scalar_prefetch = 0 : i64, scratch_operands = 0 : i64, tpu.core_type = #tpu.core_type<tc>} {
    %c0 = arith.constant 0 : index
    %c0_0 = arith.constant 0 : index
    %0 = vector.load %arg0[%c0, %c0_0] : memref<32x32xf32, #tpu.memory_space<vmem>>, vector<32x32xf32>
    %c0_1 = arith.constant 0 : index
    %c0_2 = arith.constant 0 : index
    %1 = vector.load %arg1[%c0_1, %c0_2] : memref<32x96xf32, #tpu.memory_space<vmem>>, vector<32x96xf32>
    %cst = arith.constant dense<0.000000e+00> : vector<32x96xf32>
    %2 = tpu.matmul %0, %1, %cst {dimension_numbers = #tpu.dot_dimension_numbers<[1], [0], [0], [1], [0, 0, 1, 1], [], []>} : vector<32x32xf32>, vector<32x96xf32>, vector<32x96xf32> -> vector<32x96xf32>
    %c0_3 = arith.constant 0 : index
    %c0_4 = arith.constant 0 : index
    %3 = vector.load %arg2[%c0_3, %c0_4] : memref<1x96xf32, #tpu.memory_space<vmem>>, vector<1x96xf32>
    %4 = vector.broadcast %3 : vector<1x96xf32> to vector<32x96xf32>
    %5 = arith.addf %2, %4 : vector<32x96xf32>
    %6 = vector.extract_strided_slice %5 {offsets = [0, 0], sizes = [16, 32], strides = [1, 1]} : vector<32x96xf32> to vector<16x32xf32>
    %7 = vector.extract_strided_slice %5 {offsets = [16, 32], sizes = [16, 32], strides = [1, 1]} : vector<32x96xf32> to vector<16x32xf32>
    %8 = vector.extract_strided_slice %5 {offsets = [16, 64], sizes = [16, 32], strides = [1, 1]} : vector<32x96xf32> to vector<16x32xf32>
    %9 = tpu.iota {dimensions = array<i32: 0>} : vector<64x32xi32>
    %10 = tpu.iota {dimensions = array<i32: 1>} : vector<64x32xi32>
    %c4_i32 = arith.constant 4 : i32
    %11 = vector.broadcast %c4_i32 : i32 to vector<64x32xi32>
    %12 = arith.shrsi %9, %11 : vector<64x32xi32>
    %c3_i32 = arith.constant 3 : i32
    %13 = vector.broadcast %c3_i32 : i32 to vector<64x32xi32>
    %14 = arith.shrsi %10, %13 : vector<64x32xi32>
    %15 = arith.cmpi eq, %12, %14 : vector<64x32xi32>
    %cst_5 = arith.constant 1.000000e+00 : f32
    %cst_6 = arith.constant 0.000000e+00 : f32
    %16 = vector.broadcast %cst_5 : f32 to vector<64x32xf32>
    %17 = vector.broadcast %cst_6 : f32 to vector<64x32xf32>
    %18 = arith.select %15, %16, %17 : vector<64x32xi1>, vector<64x32xf32>
    %19 = tpu.concatenate %7, %7, %7, %7 in 0 : vector<16x32xf32>, vector<16x32xf32>, vector<16x32xf32>, vector<16x32xf32> -> vector<64x32xf32>
    %20 = arith.mulf %19, %18 : vector<64x32xf32>
    %21 = tpu.concatenate %8, %8, %8, %8 in 0 : vector<16x32xf32>, vector<16x32xf32>, vector<16x32xf32>, vector<16x32xf32> -> vector<64x32xf32>
    %22 = arith.mulf %21, %18 : vector<64x32xf32>
    %cst_7 = arith.constant dense<0.000000e+00> : vector<16x64xf32>
    %23 = tpu.matmul %6, %20, %cst_7 {dimension_numbers = #tpu.dot_dimension_numbers<[1], [1], [0], [0], [0, 0, 1, 0], [], []>} : vector<16x32xf32>, vector<64x32xf32>, vector<16x64xf32> -> vector<16x64xf32>
    %cst_8 = arith.constant 0.353553385 : f32
    %24 = vector.broadcast %cst_8 : f32 to vector<16x64xf32>
    %25 = arith.mulf %23, %24 : vector<16x64xf32>
    %26 = tpu.iota {dimensions = array<i32: 0>} : vector<16x64xi32>
    %27 = tpu.iota {dimensions = array<i32: 1>} : vector<16x64xi32>
    %c3_i32_9 = arith.constant 3 : i32
    %28 = vector.broadcast %c3_i32_9 : i32 to vector<16x64xi32>
    %29 = arith.shrsi %26, %28 : vector<16x64xi32>
    %c3_i32_10 = arith.constant 3 : i32
    %30 = vector.broadcast %c3_i32_10 : i32 to vector<16x64xi32>
    %31 = arith.shrsi %27, %30 : vector<16x64xi32>
    %c1_i32 = arith.constant 1 : i32
    %32 = vector.broadcast %c1_i32 : i32 to vector<16x64xi32>
    %33 = arith.andi %31, %32 : vector<16x64xi32>
    %34 = arith.cmpi eq, %29, %33 : vector<16x64xi32>
    %cst_11 = arith.constant 1.000000e+00 : f32
    %cst_12 = arith.constant 0.000000e+00 : f32
    %35 = vector.broadcast %cst_11 : f32 to vector<16x64xf32>
    %36 = vector.broadcast %cst_12 : f32 to vector<16x64xf32>
    %37 = arith.select %34, %35, %36 : vector<16x64xi1>, vector<16x64xf32>
    %cst_13 = arith.constant dense<0xFF800000> : vector<16xf32>
    %38 = vector.multi_reduction <maximumf>, %25, %cst_13 [1] : vector<16x64xf32> to vector<16xf32>
    %39 = vector.shape_cast %38 : vector<16xf32> to vector<16x1xf32>
    %40 = vector.broadcast %39 : vector<16x1xf32> to vector<16x64xf32>
    %41 = arith.subf %25, %40 : vector<16x64xf32>
    %42 = math.exp %41 : vector<16x64xf32>
    %43 = arith.mulf %42, %37 : vector<16x64xf32>
    %44 = tpu.iota {dimensions = array<i32: 0>} : vector<64x64xi32>
    %45 = tpu.iota {dimensions = array<i32: 1>} : vector<64x64xi32>
    %c3_i32_14 = arith.constant 3 : i32
    %46 = vector.broadcast %c3_i32_14 : i32 to vector<64x64xi32>
    %47 = arith.shrsi %44, %46 : vector<64x64xi32>
    %c3_i32_15 = arith.constant 3 : i32
    %48 = vector.broadcast %c3_i32_15 : i32 to vector<64x64xi32>
    %49 = arith.shrsi %45, %48 : vector<64x64xi32>
    %50 = arith.cmpi eq, %47, %49 : vector<64x64xi32>
    %cst_16 = arith.constant 1.000000e+00 : f32
    %cst_17 = arith.constant 0.000000e+00 : f32
    %51 = vector.broadcast %cst_16 : f32 to vector<64x64xf32>
    %52 = vector.broadcast %cst_17 : f32 to vector<64x64xf32>
    %53 = arith.select %50, %51, %52 : vector<64x64xi1>, vector<64x64xf32>
    %cst_18 = arith.constant dense<0.000000e+00> : vector<16x64xf32>
    %54 = tpu.matmul %43, %53, %cst_18 {dimension_numbers = #tpu.dot_dimension_numbers<[1], [0], [0], [1], [0, 0, 1, 1], [], []>} : vector<16x64xf32>, vector<64x64xf32>, vector<16x64xf32> -> vector<16x64xf32>
    %cst_19 = arith.constant 1.000000e+00 : f32
    %55 = vector.broadcast %cst_19 : f32 to vector<16x64xf32>
    %56 = arith.subf %55, %37 : vector<16x64xf32>
    %57 = arith.addf %54, %56 : vector<16x64xf32>
    %58 = tpu.reciprocal %57 {approx = true} : vector<16x64xf32> -> vector<16x64xf32>
    %59 = arith.mulf %43, %58 : vector<16x64xf32>
    %cst_20 = arith.constant dense<0.000000e+00> : vector<16x32xf32>
    %60 = tpu.matmul %59, %22, %cst_20 {dimension_numbers = #tpu.dot_dimension_numbers<[1], [0], [0], [1], [0, 0, 1, 1], [], []>} : vector<16x64xf32>, vector<64x32xf32>, vector<16x32xf32> -> vector<16x32xf32>
    %61 = tpu.iota {dimensions = array<i32: 0>} : vector<64x8xi32>
    %62 = tpu.iota {dimensions = array<i32: 1>} : vector<64x8xi32>
    %c7_i32 = arith.constant 7 : i32
    %63 = vector.broadcast %c7_i32 : i32 to vector<64x8xi32>
    %64 = arith.andi %61, %63 : vector<64x8xi32>
    %65 = arith.cmpi eq, %64, %62 : vector<64x8xi32>
    %cst_21 = arith.constant 1.000000e+00 : f32
    %cst_22 = arith.constant 0.000000e+00 : f32
    %66 = vector.broadcast %cst_21 : f32 to vector<64x8xf32>
    %67 = vector.broadcast %cst_22 : f32 to vector<64x8xf32>
    %68 = arith.select %65, %66, %67 : vector<64x8xi1>, vector<64x8xf32>
    %cst_23 = arith.constant dense<0.000000e+00> : vector<16x8xf32>
    %69 = tpu.matmul %59, %68, %cst_23 {dimension_numbers = #tpu.dot_dimension_numbers<[1], [0], [0], [1], [0, 0, 1, 1], [], []>} : vector<16x64xf32>, vector<64x8xf32>, vector<16x8xf32> -> vector<16x8xf32>
    %cst_24 = arith.constant 2.500000e-01 : f32
    %70 = vector.broadcast %cst_24 : f32 to vector<16x8xf32>
    %71 = arith.mulf %69, %70 : vector<16x8xf32>
    %c0_25 = arith.constant 0 : index
    %c0_26 = arith.constant 0 : index
    %72 = vector.load %arg12[%c0_25, %c0_26] : memref<16x8xf32, #tpu.memory_space<vmem>>, vector<16x8xf32>
    tpu.vector_store %arg12[%c0_25, %c0_26], %71 {strides = array<i32>} : memref<16x8xf32, #tpu.memory_space<vmem>>, vector<16x8xf32>,
    %c0_27 = arith.constant 0 : index
    %c0_28 = arith.constant 0 : index
    %73 = vector.load %arg3[%c0_27, %c0_28] : memref<32x32xf32, #tpu.memory_space<vmem>>, vector<32x32xf32>
    %cst_29 = arith.constant dense<0.000000e+00> : vector<16x32xf32>
    %74 = tpu.matmul %60, %73, %cst_29 {dimension_numbers = #tpu.dot_dimension_numbers<[1], [0], [0], [1], [0, 0, 1, 1], [], []>} : vector<16x32xf32>, vector<32x32xf32>, vector<16x32xf32> -> vector<16x32xf32>
    %c0_30 = arith.constant 0 : index
    %c0_31 = arith.constant 0 : index
    %75 = vector.load %arg4[%c0_30, %c0_31] : memref<1x32xf32, #tpu.memory_space<vmem>>, vector<1x32xf32>
    %76 = vector.broadcast %75 : vector<1x32xf32> to vector<16x32xf32>
    %77 = arith.addf %74, %76 : vector<16x32xf32>
    %78 = vector.extract_strided_slice %0 {offsets = [0, 0], sizes = [16, 32], strides = [1, 1]} : vector<32x32xf32> to vector<16x32xf32>
    %79 = arith.addf %78, %77 : vector<16x32xf32>
    %c0_32 = arith.constant 0 : index
    %c0_33 = arith.constant 0 : index
    %80 = vector.load %arg5[%c0_32, %c0_33] : memref<1x32xf32, #tpu.memory_space<vmem>>, vector<1x32xf32>
    %c0_34 = arith.constant 0 : index
    %c0_35 = arith.constant 0 : index
    %81 = vector.load %arg6[%c0_34, %c0_35] : memref<1x32xf32, #tpu.memory_space<vmem>>, vector<1x32xf32>
    %cst_36 = arith.constant dense<0.000000e+00> : vector<16xf32>
    %82 = vector.multi_reduction <add>, %79, %cst_36 [1] : vector<16x32xf32> to vector<16xf32>
    %83 = vector.shape_cast %82 : vector<16xf32> to vector<16x1xf32>
    %cst_37 = arith.constant 3.200000e+01 : f32
    %84 = vector.broadcast %cst_37 : f32 to vector<16x1xf32>
    %85 = arith.divf %83, %84 : vector<16x1xf32>
    %86 = vector.broadcast %85 : vector<16x1xf32> to vector<16x32xf32>
    %87 = arith.subf %79, %86 : vector<16x32xf32>
    %88 = arith.mulf %87, %87 : vector<16x32xf32>
    %cst_38 = arith.constant dense<0.000000e+00> : vector<16xf32>
    %89 = vector.multi_reduction <add>, %88, %cst_38 [1] : vector<16x32xf32> to vector<16xf32>
    %90 = vector.shape_cast %89 : vector<16xf32> to vector<16x1xf32>
    %cst_39 = arith.constant 3.200000e+01 : f32
    %91 = vector.broadcast %cst_39 : f32 to vector<16x1xf32>
    %92 = arith.divf %90, %91 : vector<16x1xf32>
    %93 = vector.broadcast %85 : vector<16x1xf32> to vector<16x32xf32>
    %94 = arith.subf %79, %93 : vector<16x32xf32>
    %cst_40 = arith.constant 9.99999974E-6 : f32
    %95 = vector.broadcast %cst_40 : f32 to vector<16x1xf32>
    %96 = arith.addf %92, %95 : vector<16x1xf32>
    %97 = math.rsqrt %96 : vector<16x1xf32>
    %98 = vector.broadcast %97 : vector<16x1xf32> to vector<16x32xf32>
    %99 = arith.mulf %94, %98 : vector<16x32xf32>
    %100 = vector.broadcast %80 : vector<1x32xf32> to vector<16x32xf32>
    %101 = arith.mulf %99, %100 : vector<16x32xf32>
    %102 = vector.broadcast %81 : vector<1x32xf32> to vector<16x32xf32>
    %103 = arith.addf %101, %102 : vector<16x32xf32>
    %c0_41 = arith.constant 0 : index
    %c0_42 = arith.constant 0 : index
    %104 = vector.load %arg7[%c0_41, %c0_42] : memref<32x64xf32, #tpu.memory_space<vmem>>, vector<32x64xf32>
    %cst_43 = arith.constant dense<0.000000e+00> : vector<16x64xf32>
    %105 = tpu.matmul %103, %104, %cst_43 {dimension_numbers = #tpu.dot_dimension_numbers<[1], [0], [0], [1], [0, 0, 1, 1], [], []>} : vector<16x32xf32>, vector<32x64xf32>, vector<16x64xf32> -> vector<16x64xf32>
    %cst_44 = arith.constant 0.000000e+00 : f32
    %106 = vector.broadcast %cst_44 : f32 to vector<16x64xf32>
    %107 = arith.cmpf oge, %105, %106 : vector<16x64xf32>
    %cst_45 = arith.constant 0.00999999977 : f32
    %108 = vector.broadcast %cst_45 : f32 to vector<16x64xf32>
    %109 = arith.mulf %108, %105 : vector<16x64xf32>
    %110 = arith.select %107, %105, %109 : vector<16x64xi1>, vector<16x64xf32>
    %c0_46 = arith.constant 0 : index
    %c0_47 = arith.constant 0 : index
    %111 = vector.load %arg8[%c0_46, %c0_47] : memref<64x32xf32, #tpu.memory_space<vmem>>, vector<64x32xf32>
    %cst_48 = arith.constant dense<0.000000e+00> : vector<16x32xf32>
    %112 = tpu.matmul %110, %111, %cst_48 {dimension_numbers = #tpu.dot_dimension_numbers<[1], [0], [0], [1], [0, 0, 1, 1], [], []>} : vector<16x64xf32>, vector<64x32xf32>, vector<16x32xf32> -> vector<16x32xf32>
    %113 = arith.addf %103, %112 : vector<16x32xf32>
    %c0_49 = arith.constant 0 : index
    %c0_50 = arith.constant 0 : index
    %114 = vector.load %arg9[%c0_49, %c0_50] : memref<1x32xf32, #tpu.memory_space<vmem>>, vector<1x32xf32>
    %c0_51 = arith.constant 0 : index
    %c0_52 = arith.constant 0 : index
    %115 = vector.load %arg10[%c0_51, %c0_52] : memref<1x32xf32, #tpu.memory_space<vmem>>, vector<1x32xf32>
    %cst_53 = arith.constant dense<0.000000e+00> : vector<16xf32>
    %116 = vector.multi_reduction <add>, %113, %cst_53 [1] : vector<16x32xf32> to vector<16xf32>
    %117 = vector.shape_cast %116 : vector<16xf32> to vector<16x1xf32>
    %cst_54 = arith.constant 3.200000e+01 : f32
    %118 = vector.broadcast %cst_54 : f32 to vector<16x1xf32>
    %119 = arith.divf %117, %118 : vector<16x1xf32>
    %120 = vector.broadcast %119 : vector<16x1xf32> to vector<16x32xf32>
    %121 = arith.subf %113, %120 : vector<16x32xf32>
    %122 = arith.mulf %121, %121 : vector<16x32xf32>
    %cst_55 = arith.constant dense<0.000000e+00> : vector<16xf32>
    %123 = vector.multi_reduction <add>, %122, %cst_55 [1] : vector<16x32xf32> to vector<16xf32>
    %124 = vector.shape_cast %123 : vector<16xf32> to vector<16x1xf32>
    %cst_56 = arith.constant 3.200000e+01 : f32
    %125 = vector.broadcast %cst_56 : f32 to vector<16x1xf32>
    %126 = arith.divf %124, %125 : vector<16x1xf32>
    %127 = vector.broadcast %119 : vector<16x1xf32> to vector<16x32xf32>
    %128 = arith.subf %113, %127 : vector<16x32xf32>
    %cst_57 = arith.constant 9.99999974E-6 : f32
    %129 = vector.broadcast %cst_57 : f32 to vector<16x1xf32>
    %130 = arith.addf %126, %129 : vector<16x1xf32>
    %131 = math.rsqrt %130 : vector<16x1xf32>
    %132 = vector.broadcast %131 : vector<16x1xf32> to vector<16x32xf32>
    %133 = arith.mulf %128, %132 : vector<16x32xf32>
    %134 = vector.broadcast %114 : vector<1x32xf32> to vector<16x32xf32>
    %135 = arith.mulf %133, %134 : vector<16x32xf32>
    %136 = vector.broadcast %115 : vector<1x32xf32> to vector<16x32xf32>
    %137 = arith.addf %135, %136 : vector<16x32xf32>
    %c0_58 = arith.constant 0 : index
    %c0_59 = arith.constant 0 : index
    %138 = vector.load %arg11[%c0_58, %c0_59] : memref<16x32xf32, #tpu.memory_space<vmem>>, vector<16x32xf32>
    tpu.vector_store %arg11[%c0_58, %c0_59], %137 {strides = array<i32>} : memref<16x32xf32, #tpu.memory_space<vmem>>, vector<16x32xf32>,
    return
  }
}

</mosaic_0001>

<bundles_post_ra>
// kernel: tpu_custom_call.1
= control target key start
LH: loop header
LB: loop body
LE: loop exit
PB: predicated region body
PF: predicated region fallthrough
CT: control target
= control target key end

     0   :  { %18 = vsyncpa [#allocation3], 0  ;;  %s2064_s0 = inlined_call_operand.vmem [shape: f32[32,32], index: 0, kind: input, shape index: {}]   ;;  %s2065_s1 = inlined_call_operand.vmem [shape: f32[32,96], index: 1, kind: input, shape index: {}]   ;;  %s2066_s2 = inlined_call_operand.vmem [shape: f32[1,96], index: 2, kind: input, shape index: {}]   ;;  %s2067_s3 = inlined_call_operand.vmem [shape: f32[32,32], index: 3, kind: input, shape index: {}]   ;;  %s2068_s4 = inlined_call_operand.vmem [shape: f32[1,32], index: 4, kind: input, shape index: {}]   ;;  %s2069_s5 = inlined_call_operand.vmem [shape: f32[1,32], index: 5, kind: input, shape index: {}]   ;;  %s2070_s6 = inlined_call_operand.vmem [shape: f32[1,32], index: 6, kind: input, shape index: {}]   ;;  %s2071_s7 = inlined_call_operand.hbm [shape: f32[32,64], index: 7, kind: input, shape index: {}]   ;;  %s2072_s8 = inlined_call_operand.vmem [shape: f32[64,32], index: 8, kind: input, shape index: {}]   ;;  %s2073_s9 = inlined_call_operand.vmem [shape: f32[1,32], index: 9, kind: input, shape index: {}]   ;;  %s2074_s10 = inlined_call_operand.vmem [shape: f32[1,32], index: 10, kind: input, shape index: {}]   ;;  %s2075_s11 = inlined_call_operand.hbm [shape: f32[16,32], index: 11, kind: output, shape index: {0}]   ;;  %s2076_s12 = inlined_call_operand.vmem [shape: f32[16,8], index: 12, kind: output, shape index: {1}]  }
   0x1   :  { %19 = vsyncpa [#allocation4], 0  ;;  %s1649_s21 = smov [#allocation2]   ;;  %s1601_s25 = scalar_lea.hbm %s2071_s7, 512 }
   0x2   :  { %s39_s22 = sshll.u32 %s1649_s21, 4  ;;  %p1602_p0 = scmp.ne.s32.totalorder %s2071_s7, %s1601_s25  ;;  %s40_s22 = int_to_ptr.vmem [resolvable:$true] %s39_s22 }
   0x3   :  { %p1605_p1 = scmp.lt.u32.totalorder %s1601_s25, %s2071_s7 }
   0x5   :  { %p1607_p2 = pnand %p1605_p1, %p1602_p0 }
   0x7   :  { %1610 = shalt.err (!%p1607_p2)
}
   0x8   :  { %s1611_s30 = scalar_lea.vmem %s40_s22, 512  ;;  %p1616_p4 = scmp.lt.s32.totalorder %s40_s22, %s40_s22 }
   0x9   :  { %p1612_p3 = scmp.ne.s32.totalorder %s40_s22, %s1611_s30  ;;  %p1617_p5 = scmp.lt.s32.totalorder %s1611_s30, %s1611_s30 }
   0xb   :  { %p1618_p6 = por %p1617_p5, %p1616_p4 }
   0xd   :  { %p1619_p7 = pnand %p1618_p6, %p1612_p3 }
   0xf   :  { %1622 = shalt.err (!%p1619_p7)
}
  0x10   :  { %s1650_s13 = smov 128   ;;  %s1651_s14 = smov 8  }
  0x11   :  { %45 = dma.hbm_to_vmem [thread:$0]  %s2071_s7, 512, %s40_s22, [#allocation3], %s1650_s13, %s1650_s13, %s1651_s14  }
  0x12   :  { %1645 = dma.done.wait [#allocation3], 512  }
  0x13   :  { %1646 = vsyncadd [#allocation3], 4294966784  ;;  %v168_v0 = vlaneseq  ;;  %vm70_vm0 = vcmask 261120   ;;  %v59_v15 = vld [vmem:[%s2065_s1] sm:$0xff]  ;;  %v60_v16 = vld [vmem:[%s2065_s1 + $0x8] sm:$0xff]  ;;  %v1652_v25 = vmov 0.0  }
  0x14   :  { %v61_v17 = vld [vmem:[%s2065_s1 + $0x10] sm:$0xff]  ;;  %v1384_v21 = vpack.c.bf16 %v60_v16, %v59_v15  ;;  %v62_v22 = vld [vmem:[%s2065_s1 + $0x18] sm:$0xff]  ;;  %v1789_v23 = vld [vmem:[%s2064_s0] sm:$0xff]  ;;  %s1653_s1 = smov 32   ;;  %vm406_vm10 = vcmask 523264   ;;  %s1657_s27 = smov [#allocation5]  }
  0x15   :  { %v1738_v1 = vshrl.u32 %v168_v0, 7  ;;  %v1740_v2 = vand.u32 127, %v168_v0  ;;  %v1388_v24 = vpack.c.bf16 %v62_v22, %v61_v17  ;;  %1261 = vmatprep.mubr.msk.f32.mxu0 %vm70_vm0, %v1789_v23  ;;  %v1819_v37 = vld [vmem:[%s2064_s0 + $0x8] sm:$0xff]  ;;  %v57_v39 = vld [vmem:[%s2064_s0 + $0x10] sm:$0xff]  ;;  %v58_v41 = vld [vmem:[%s2064_s0 + $0x18] sm:$0xff]  ;;  %s1654_s0 = smov 96  }
  0x16   :  { %1385 = vmatprep.subr.bf16.mxu0 %v1384_v21  ;;  %v1135_v44 = vld [vmem:[%s2066_s2] ss:$0 sm:$0xff]  ;;  %vm1854_vm9 = vmpackc.low %vm70_vm0, %vm70_vm0  ;;  %s1655_s2 = smov 64   ;;  %s1119_s28 = sshll.u32 %s1657_s27, 4  ;;  %s1120_s28 = int_to_ptr.vmem [resolvable:$true] %s1119_s28 }
  0x17   :  { %v1743_v3 = vadd.s32 32, %v1738_v1  ;;  %v1746_v4 = vadd.s32 40, %v1738_v1  ;;  %v1749_v5 = vshra.s32 %v1740_v2, 3  ;;  %v1752_v6 = vadd.s32 8, %v1738_v1  ;;  %1387 = vmatpush3.bf16.msra.mxu0 %v1384_v21  ;;  %p1628_p9 = scmp.lt.s32.totalorder %s1120_s28, %s1120_s28 }
  0x18   :  { %v179_v7 = vshra.s32 %v1738_v1, 4  ;;  %v1756_v8 = vadd.s32 48, %v1738_v1  ;;  %v1759_v9 = vadd.s32 56, %v1738_v1  ;;  %v1762_v10 = vadd.s32 16, %v1738_v1  ;;  %1389 = vmatprep.subr.bf16.mxu0 %v1388_v24 }
  0x19   :  { %v183_v11 = vshra.s32 %v1743_v3, 4  ;;  %v184_v12 = vshra.s32 %v1746_v4, 4  ;;  %v180_v13 = vshra.s32 %v1752_v6, 4  ;;  %v1768_v14 = vadd.s32 24, %v1738_v1 }
  0x1a   :  { %vm188_vm1 = vcmp.eq.s32.totalorder %v179_v7, %v1749_v5  ;;  %v185_v18 = vshra.s32 %v1756_v8, 4  ;;  %v186_v19 = vshra.s32 %v1759_v9, 4  ;;  %v181_v20 = vshra.s32 %v1762_v10, 4 }
  0x1b   :  { %vm192_vm2 = vcmp.eq.s32.totalorder %v183_v11, %v1749_v5  ;;  %vm193_vm3 = vcmp.eq.s32.totalorder %v184_v12, %v1749_v5  ;;  %vm189_vm4 = vcmp.eq.s32.totalorder %v180_v13, %v1749_v5  ;;  %v196_v28 = vsel %vm188_vm1, 1.0, %v1652_v25  ;;  %1391 = vmatpush3.bf16.msra.mxu0 %v1388_v24 }
  0x1c   :  { %v200_v26 = vsel %vm192_vm2, 1.0, %v1652_v25  ;;  %v201_v27 = vsel %vm193_vm3, 1.0, %v1652_v25  ;;  %v197_v30 = vsel %vm189_vm4, 1.0, %v1652_v25  ;;  %vm194_vm5 = vcmp.eq.s32.totalorder %v185_v18, %v1749_v5 }
  0x1d   :  { %v1799_v29 = vpack.i.bf16 %v201_v27, %v200_v26  ;;  %v1803_v31 = vpack.i.bf16 %v197_v30, %v196_v28  ;;  %vm195_vm6 = vcmp.eq.s32.totalorder %v186_v19, %v1749_v5  ;;  %v202_v32 = vsel %vm194_vm5, 1.0, %v1652_v25 }
  0x1e   :  { %v203_v33 = vsel %vm195_vm6, 1.0, %v1652_v25  ;;  %v182_v34 = vshra.s32 %v1768_v14, 4  ;;  %vm190_vm7 = vcmp.eq.s32.totalorder %v181_v20, %v1749_v5  ;;  %1262 = vmatmul.mubr.msk.f32.vlgmr.msra.gmra.mrb[0].mxu0 %vm70_vm0, %v1819_v37 }
  0x1f   :  { %1516 = vrot.lane.b32.xlu1 %v1799_v29, %s1653_s1  ;;  %1506 = vrot.lane.b32.xlu0 %v1803_v31, %s1653_s1  ;;  %v1812_v35 = vpack.i.bf16 %v203_v33, %v202_v32  ;;  %v198_v36 = vsel %vm190_vm7, 1.0, %v1652_v25 }
  0x20   :  { %vm191_vm8 = vcmp.eq.s32.totalorder %v182_v34, %v1749_v5  ;;  %1264 = vmatprep.mubr.msk.f32.mxu0 %vm70_vm0, %v57_v39 }
  0x21   :  { %v199_v38 = vsel %vm191_vm8, 1.0, %v1652_v25 }
  0x22   :  { %v1826_v40 = vpack.i.bf16 %v199_v38, %v198_v36  ;;  %1265 = vmatmul.mubr.msk.f32.gmra.mrb[2].mxu0 %vm70_vm0, %v58_v41 }
  0x23   :  { %1521 = vrot.lane.b32.xlu1 %v1812_v35, %s1653_s1 }
  0x24   :  { %1511 = vrot.lane.b32.xlu0 %v1826_v40, %s1653_s1 }
  0x91   :  { %v1507_v42 = vpop.permute.xlu0 %1506  ;;  %v1517_v43 = vpop.permute.xlu1 %1516 }
  0x92   :  { %v1509_v51 = vunpack.i.h.bf16 %v1507_v42  ;;  %v1508_v53 = vunpack.i.l.bf16 %v1507_v42  ;;  %v1519_v56 = vunpack.i.h.bf16 %v1517_v43  ;;  %v1518_v60 = vunpack.i.l.bf16 %v1517_v43 }
  0x95   :  { %v1522_v50 = vpop.permute.xlu1 %1521 }
  0x96   :  { %v1512_v46 = vpop.permute.xlu0 %1511  ;;  %v1524_v57 = vunpack.i.h.bf16 %v1522_v50  ;;  %v1523_v61 = vunpack.i.l.bf16 %v1522_v50 }
  0x97   :  { %v1514_v52 = vunpack.i.h.bf16 %v1512_v46  ;;  %v1513_v54 = vunpack.i.l.bf16 %v1512_v46 }
  0xf1   :  { %v1263_v45 = vpop.f32.mrb[0].mxu0 }
  0xf2   :  { %v155_v47 = vadd.f32 %v1263_v45, %v1135_v44  ;;  %v149_v48 = vpop.f32.mrb[1].mxu0 }
  0xf3   :  { %v150_v49 = vadd.f32 %v1135_v44, %v149_v48 }
  0xf5   :  { %v1266_v55 = vpop.f32.mrb[2].mxu0  ;;  %1283 = vmatprep.mubr.msk.f32.mxu1 %vm70_vm0, %v150_v49 }
  0xf6   :  { %v1840_v58 = vadd.f32 %v1266_v55, %v1135_v44  ;;  %v159_v59 = vpop.f32.mrb[3].mxu0  ;;  %v422_v55 = vshra.s32 %v1768_v14, 3 }
  0xf7   :  { %v1842_v62 = vadd.f32 %v1135_v44, %v159_v59 }
  0xf8   :  { %v239_v63 = vmul.f32 %v1514_v52, %v1840_v58  ;;  %v237_v0 = vmul.f32 %v1509_v51, %v1840_v58  ;;  %v243_v12 = vmul.f32 %v1524_v57, %v1840_v58  ;;  %v241_v13 = vmul.f32 %v1519_v56, %v1840_v58 }
  0xf9   :  { %v238_v7 = vmul.f32 %v1513_v54, %v1842_v62  ;;  %v236_v11 = vmul.f32 %v1508_v53, %v1842_v62  ;;  %v242_v17 = vmul.f32 %v1523_v61, %v1842_v62  ;;  %v240_v18 = vmul.f32 %v1518_v60, %v1842_v62 }
  0xfa   :  { %v399_v52 = vshra.s32 %v1738_v1, 3  ;;  %v400_v53 = vshra.s32 %v1752_v6, 3  ;;  %v421_v54 = vshra.s32 %v1762_v10, 3  ;;  %vm430_vm15 = vcmp.eq.s32.totalorder %v422_v55, %v1749_v5 }
  0xfb   :  { %v1530_v15 = vpack.i.bf16 %v239_v63, %v238_v7  ;;  %v1525_v16 = vpack.i.bf16 %v237_v0, %v236_v11  ;;  %v1540_v19 = vpack.i.bf16 %v243_v12, %v242_v17  ;;  %v1535_v20 = vpack.i.bf16 %v241_v13, %v240_v18 }
  0xfc   :  { %vm427_vm11 = vcmp.eq.s32.totalorder %v399_v52, %v1749_v5  ;;  %vm428_vm12 = vcmp.eq.s32.totalorder %v400_v53, %v1749_v5  ;;  %vm429_vm14 = vcmp.eq.s32.totalorder %v421_v54, %v1749_v5  ;;  %v424_v56 = vshra.s32 %v1746_v4, 3 }
  0xfd   :  { %1531 = vrot.lane.b32.xlu1 %v1530_v15, %s1654_s0  ;;  %1526 = vrot.lane.b32.xlu0 %v1525_v16, %s1654_s0  ;;  %vm1416_vm13 = vmpackc.low %vm428_vm12, %vm427_vm11  ;;  %v426_v57 = vshra.s32 %v1759_v9, 3  ;;  %v401_v16 = vand.u32 1, %v1749_v5 }
  0xfe   :  { %vm1420_vm1 = vmpackc.low %vm430_vm15, %vm429_vm14  ;;  %vm432_vm3 = vcmp.eq.s32.totalorder %v424_v56, %v1749_v5 }
  0xff   :  { %vm434_vm6 = vcmp.eq.s32.totalorder %v426_v57, %v1749_v5  ;;  %vm402_vm8 = vcmp.eq.s32.totalorder %v399_v52, %v401_v16  ;;  %v748_v57 = vld [vmem:[%s2067_s3 + $0x8] sm:$0xff] }
 0x101   :  { %1541 = vrot.lane.b32.xlu1 %v1540_v19, %s1654_s0  ;;  %1536 = vrot.lane.b32.xlu0 %v1535_v20, %s1654_s0 }
 0x16f   :  { %v1532_v21 = vpop.permute.xlu1 %1531  ;;  %v1527_v22 = vpop.permute.xlu0 %1526 }
 0x170   :  { %v1534_v24 = vunpack.i.h.bf16 %v1532_v21  ;;  %v1533_v26 = vunpack.i.l.bf16 %v1532_v21  ;;  %v1529_v27 = vunpack.i.h.bf16 %v1527_v22  ;;  %v1528_v28 = vunpack.i.l.bf16 %v1527_v22 }
 0x172   :  { %v1392_v32 = vpack.c.bf16 %v1529_v27, %v1528_v28  ;;  %v1398_v33 = vpack.c.bf16 %v1534_v24, %v1533_v26 }
 0x173   :  { %v1537_v34 = vpop.permute.xlu0 %1536  ;;  %v1542_v41 = vpop.permute.xlu1 %1541 }
 0x174   :  { %1394 = vmatprep.subr.msk.bf16.mxu1 %vm1854_vm9, %v1392_v32  ;;  %v1539_v36 = vunpack.i.h.bf16 %v1537_v34  ;;  %v1538_v38 = vunpack.i.l.bf16 %v1537_v34  ;;  %v1544_v42 = vunpack.i.h.bf16 %v1542_v41  ;;  %v1543_v43 = vunpack.i.l.bf16 %v1542_v41 }
 0x175   :  { %1397 = vmatpush3.bf16.xpose.msk.msra.mxu1 %vm1854_vm9, %v1392_v32  ;;  %v1925_v41 = vsel %vm402_vm8, 1.0, %v1652_v25  ;;  %vm744_vm8 = vcmask 64512  }
 0x176   :  { %1400 = vmatprep.subr.msk.bf16.mxu1 %vm1854_vm9, %v1398_v33  ;;  %v1404_v39 = vpack.c.bf16 %v1539_v36, %v1538_v38  ;;  %v1410_v44 = vpack.c.bf16 %v1544_v42, %v1543_v43 }
 0x17d   :  { %1403 = vmatpush3.bf16.xpose.msk.msra.mxu1 %vm1854_vm9, %v1398_v33 }
 0x17e   :  { %1406 = vmatprep.subr.msk.bf16.mxu1 %vm1854_vm9, %v1404_v39 }
 0x185   :  { %1409 = vmatpush3.bf16.xpose.msk.msra.mxu1 %vm1854_vm9, %v1404_v39 }
 0x186   :  { %1412 = vmatprep.subr.msk.bf16.mxu1 %vm1854_vm9, %v1410_v44 }
 0x18d   :  { %1415 = vmatpush3.bf16.xpose.msk.msra.mxu1 %vm1854_vm9, %v1410_v44  ;;  %vm403_vm9 = vcmp.eq.s32.totalorder %v400_v53, %v401_v16 }
 0x18e   :  { %v1928_v43 = vsel %vm403_vm9, 1.0, %v1652_v25  ;;  %v643_v25 = vand.u32 7, %v1738_v1  ;;  %v647_v1 = vand.u32 7, %v1743_v3 }
 0x190   :  { %vm651_vm11 = vcmp.eq.s32.totalorder %v643_v25, %v1740_v2 }
 0x194   :  { %1284 = vmatmul.mubr.msk.f32.vlgmr.msra.gmra.mrb[0].mxu1 %vm70_vm0, %v155_v47  ;;  %v1656_v47 = vmov 1.0|1.0  }
 0x195   :  { %1417 = vmatprep.subr.msk.bf16.mxu0 %vm1416_vm13, %v1656_v47 }
 0x196   :  { %1419 = vmatpush3.bf16.msk.msra.mxu0 %vm1416_vm13, %v1656_v47 }
 0x197   :  { %1421 = vmatprep.subr.msk.bf16.mxu0 %vm1420_vm1, %v1656_v47 }
 0x19a   :  { %1423 = vmatpush3.bf16.msk.msra.mxu0 %vm1420_vm1, %v1656_v47 }
 0x267   :  { %v1285_v45 = vpop.f32.mrb[0].mxu1 }
 0x268   :  { %v398_v46 = vmul.f32 0.35355338, %v1285_v45  ;;  %v388_v48 = vpop.f32.mrb[1].mxu1  ;;  %v644_v45 = vand.u32 7, %v1752_v6  ;;  %v648_v6 = vand.u32 7, %v1746_v4 }
 0x269   :  { %v397_v49 = vmul.f32 0.35355338, %v388_v48  ;;  %v646_v48 = vand.u32 7, %v1768_v14 }
 0x26a   :  { %v410_v50 = vsel %vm406_vm10, %v398_v46, -inf  ;;  %vm652_vm12 = vcmp.eq.s32.totalorder %v644_v45, %v1740_v2 }
 0x26b   :  { %411 = vmax.xlane.f32.xlu1 %v410_v50  ;;  %v407_v51 = vsel %vm406_vm10, %v397_v49, -inf  ;;  %vm1448_vm13 = vmpackc.low %vm652_vm12, %vm651_vm11  ;;  %vm654_vm15 = vcmp.eq.s32.totalorder %v646_v48, %v1740_v2  ;;  %v650_v50 = vand.u32 7, %v1759_v9 }
 0x26c   :  { %408 = vmax.xlane.f32.xlu0 %v407_v51  ;;  %1449 = vmatprep.subr.msk.bf16.mxu1 %vm1448_vm13, %v1656_v47 }
 0x26d   :  { %1451 = vmatpush3.bf16.msk.msra.mxu1 %vm1448_vm13, %v1656_v47 }
 0x27c   :  { %1551 = vrot.lane.b32.xlu1 %v1826_v40, %s1655_s2  ;;  %v423_v40 = vshra.s32 %v1743_v3, 3 }
 0x27e   :  { %vm431_vm2 = vcmp.eq.s32.totalorder %v423_v40, %v1749_v5 }
 0x27f   :  { %vm1424_vm4 = vmpackc.low %vm432_vm3, %vm431_vm2  ;;  %vm655_vm2 = vcmp.eq.s32.totalorder %v647_v1, %v1740_v2  ;;  %vm656_vm3 = vcmp.eq.s32.totalorder %v648_v6, %v1740_v2  ;;  %v888_v1 = vld [vmem:[#allocation2 + $0x10] sm:$0xff]  ;;  %v889_v6 = vld [vmem:[#allocation2 + $0x18] sm:$0xff] }
 0x280   :  { %1561 = vrot.lane.b32.xlu1 %v1812_v35, %s1655_s2  ;;  %1425 = vmatprep.subr.msk.bf16.mxu0 %vm1424_vm4, %v1656_v47  ;;  %v425_v35 = vshra.s32 %v1756_v8, 3 }
 0x281   :  { %1427 = vmatpush3.bf16.msk.msra.mxu0 %vm1424_vm4, %v1656_v47  ;;  %vm1456_vm4 = vmpackc.low %vm656_vm3, %vm655_vm2 }
 0x282   :  { %1546 = vrot.lane.b32.xlu0 %v1803_v31, %s1655_s2  ;;  %vm433_vm5 = vcmp.eq.s32.totalorder %v425_v35, %v1749_v5 }
 0x283   :  { %vm1428_vm7 = vmpackc.low %vm434_vm6, %vm433_vm5  ;;  %vm658_vm6 = vcmp.eq.s32.totalorder %v650_v50, %v1740_v2  ;;  %v977_v50 = vld [vmem:[%s2072_s8] sm:$0xff] }
 0x284   :  { %1429 = vmatprep.subr.msk.bf16.mxu0 %vm1428_vm7, %v1656_v47 }
 0x285   :  { %1431 = vmatpush3.bf16.msk.msra.mxu0 %vm1428_vm7, %v1656_v47 }
 0x286   :  { %1556 = vrot.lane.b32.xlu0 %v1799_v29, %s1655_s2 }
 0x2f8   :  { %v412_v31 = vpop.xlane.xlu1 %411 }
 0x2f9   :  { %v414_v59 = vsub.f32 %v398_v46, %v412_v31  ;;  %v409_v60 = vpop.xlane.xlu0 %408  ;;  %v645_v46 = vand.u32 7, %v1762_v10 }
 0x2fa   :  { %v413_v61 = vsub.f32 %v397_v49, %v409_v60  ;;  %v649_v49 = vand.u32 7, %v1756_v8  ;;  %v444_v60 = vsub.f32 1.0, %v1928_v43 }
 0x2fb   :  { %v417_v63 = vmul.f32 1.442695, %v414_v59  ;;  %vm653_vm14 = vcmp.eq.s32.totalorder %v645_v46, %v1740_v2  ;;  %v887_v46 = vld [vmem:[#allocation2 + $0x8] sm:$0xff] }
 0x2fc   :  { %v415_v0 = vmul.f32 1.442695, %v413_v61  ;;  %v1552_v7 = vpop.permute.xlu1 %1551  ;;  %vm1452_vm1 = vmpackc.low %vm654_vm15, %vm653_vm14  ;;  %vm657_vm5 = vcmp.eq.s32.totalorder %v649_v49, %v1740_v2  ;;  %v443_v61 = vsub.f32 1.0, %v1925_v41  ;;  %v1476_v49 = vpack.c.bf16 %v889_v6, %v888_v1  ;;  %v1182_v1 = vld [vmem:[%s2074_s10] ss:$0 sm:$0xff] }
 0x2fd   :  { %1585 = vpow2.f32 %v417_v63  ;;  %v1554_v11 = vunpack.i.h.bf16 %v1552_v7  ;;  %v1553_v12 = vunpack.i.l.bf16 %v1552_v7  ;;  %v1547_v29 = vpop.permute.xlu0 %1546  ;;  %1453 = vmatprep.subr.msk.bf16.mxu1 %vm1452_vm1, %v1656_v47  ;;  %vm1460_vm7 = vmpackc.low %vm658_vm6, %vm657_vm5 }
 0x2fe   :  { %1587 = vpow2.f32 %v415_v0  ;;  %v1549_v13 = vunpack.i.h.bf16 %v1547_v29  ;;  %v1548_v15 = vunpack.i.l.bf16 %v1547_v29  ;;  %1455 = vmatpush3.bf16.msk.msra.mxu1 %vm1452_vm1, %v1656_v47  ;;  %v749_v29 = vld [vmem:[%s2067_s3 + $0x10] sm:$0xff] }
 0x2ff   :  { %v271_v17 = vmul.f32 %v1554_v11, %v1840_v58  ;;  %v270_v18 = vmul.f32 %v1553_v12, %v1842_v62  ;;  %1457 = vmatprep.subr.msk.bf16.mxu1 %vm1456_vm4, %v1656_v47 }
 0x300   :  { %v269_v19 = vmul.f32 %v1549_v13, %v1840_v58  ;;  %v268_v20 = vmul.f32 %v1548_v15, %v1842_v62  ;;  %v1562_v21 = vpop.permute.xlu1 %1561  ;;  %v750_v13 = vld [vmem:[%s2067_s3 + $0x18] sm:$0xff] }
 0x301   :  { %v1564_v22 = vunpack.i.h.bf16 %v1562_v21  ;;  %v1563_v24 = vunpack.i.l.bf16 %v1562_v21  ;;  %v1557_v26 = vpop.permute.xlu0 %1556  ;;  %v1570_v27 = vpack.i.bf16 %v271_v17, %v270_v18  ;;  %v1468_v18 = vpack.c.bf16 %v750_v13, %v749_v29 }
 0x302   :  { %v1559_v28 = vunpack.i.h.bf16 %v1557_v26  ;;  %v1558_v30 = vunpack.i.l.bf16 %v1557_v26  ;;  %v1565_v32 = vpack.i.bf16 %v269_v19, %v268_v20  ;;  %1459 = vmatpush3.bf16.msk.msra.mxu1 %vm1456_vm4, %v1656_v47 }
 0x303   :  { %v275_v33 = vmul.f32 %v1564_v22, %v1840_v58  ;;  %v274_v5 = vmul.f32 %v1563_v24, %v1842_v62  ;;  %1571 = vrot.lane.b32.xlu1 %v1570_v27, %s1655_s2  ;;  %1461 = vmatprep.subr.msk.bf16.mxu1 %vm1460_vm7, %v1656_v47  ;;  %v1172_v27 = vld [vmem:[%s2068_s4] ss:$0 sm:$0xff]  ;;  %s1623_s4 = scalar_lea.vmem %s1120_s28, 256 }
 0x304   :  { %v273_v34 = vmul.f32 %v1559_v28, %v1840_v58  ;;  %v272_v36 = vmul.f32 %v1558_v30, %v1842_v62  ;;  %1566 = vrot.lane.b32.xlu0 %v1565_v32, %s1655_s2  ;;  %p1624_p8 = scmp.ne.s32.totalorder %s1120_s28, %s1623_s4  ;;  %p1629_p10 = scmp.lt.s32.totalorder %s1623_s4, %s1623_s4 }
 0x305   :  { %v1580_v38 = vpack.i.bf16 %v275_v33, %v274_v5 }
 0x306   :  { %v1575_v39 = vpack.i.bf16 %v273_v34, %v272_v36  ;;  %1463 = vmatpush3.bf16.msk.msra.mxu1 %vm1460_vm7, %v1656_v47  ;;  %v747_v47 = vld [vmem:[%s2067_s3] sm:$0xff]  ;;  %p1630_p11 = por %p1629_p10, %p1628_p9 }
 0x307   :  { %v1586_v42 = vpop.eup %1585  ;;  %1581 = vrot.lane.b32.xlu1 %v1580_v38, %s1655_s2  ;;  %v1464_v59 = vpack.c.bf16 %v748_v57, %v747_v47  ;;  %v1175_v47 = vld [vmem:[%s2069_s5] ss:$0 sm:$0xff] }
 0x308   :  { %v1588_v44 = vpop.eup %1587  ;;  %1576 = vrot.lane.b32.xlu0 %v1575_v39, %s1655_s2  ;;  %v1936_v62 = vmul.f32 %v1586_v42, %v1928_v43  ;;  %p1631_p12 = pnand %p1630_p11, %p1624_p8 }
 0x309   :  { %v1933_v58 = vmul.f32 %v1588_v44, %v1925_v41 }
 0x30b   :  { %1302 = vmatprep.mubr.msk.f32.mxu0 %vm406_vm10, %v1933_v58 }
 0x30c   :  { %1303 = vmatmul.mubr.msk.f32.vlgmr.msra.gmra.mrb[4].mxu0 %vm406_vm10, %v1936_v62 }
 0x375   :  { %v1572_v3 = vpop.permute.xlu1 %1571 }
 0x376   :  { %v1567_v4 = vpop.permute.xlu0 %1566  ;;  %v1574_v8 = vunpack.i.h.bf16 %v1572_v3  ;;  %v1573_v9 = vunpack.i.l.bf16 %v1572_v3  ;;  %v978_v3 = vld [vmem:[%s2072_s8 + $0x8] sm:$0xff] }
 0x377   :  { %v1569_v10 = vunpack.i.h.bf16 %v1567_v4  ;;  %v1568_v14 = vunpack.i.l.bf16 %v1567_v4  ;;  %v979_v4 = vld [vmem:[%s2072_s8 + $0x10] sm:$0xff] }
 0x378   :  { %v1436_v53 = vpack.c.bf16 %v1574_v8, %v1573_v9  ;;  %v1480_v8 = vpack.c.bf16 %v978_v3, %v977_v50  ;;  %v980_v9 = vld [vmem:[%s2072_s8 + $0x18] sm:$0xff] }
 0x379   :  { %v1432_v51 = vpack.c.bf16 %v1569_v10, %v1568_v14  ;;  %v1582_v55 = vpop.permute.xlu1 %1581  ;;  %v1484_v10 = vpack.c.bf16 %v980_v9, %v979_v4  ;;  %v981_v14 = vld [vmem:[%s2072_s8 + $0x20] sm:$0xff] }
 0x37a   :  { %v1577_v52 = vpop.permute.xlu0 %1576  ;;  %v1584_v40 = vunpack.i.h.bf16 %v1582_v55  ;;  %v1583_v56 = vunpack.i.l.bf16 %v1582_v55  ;;  %1481 = vmatprep.subr.bf16.mxu1 %v1480_v8 }
 0x37b   :  { %v1579_v54 = vunpack.i.h.bf16 %v1577_v52  ;;  %v1578_v2 = vunpack.i.l.bf16 %v1577_v52  ;;  %1433 = vmatprep.subr.bf16.mxu0 %v1432_v51 }
 0x37c   :  { %1435 = vmatpush3.bf16.msra.mxu0 %v1432_v51  ;;  %v1444_v31 = vpack.c.bf16 %v1584_v40, %v1583_v56  ;;  %v982_v51 = vld [vmem:[%s2072_s8 + $0x28] sm:$0xff] }
 0x37d   :  { %1437 = vmatprep.subr.bf16.mxu0 %v1436_v53  ;;  %v1440_v35 = vpack.c.bf16 %v1579_v54, %v1578_v2  ;;  %v1488_v52 = vpack.c.bf16 %v982_v51, %v981_v14 }
 0x380   :  { %1439 = vmatpush3.bf16.msra.mxu0 %v1436_v53 }
 0x381   :  { %1441 = vmatprep.subr.bf16.mxu0 %v1440_v35 }
 0x384   :  { %1443 = vmatpush3.bf16.msra.mxu0 %v1440_v35 }
 0x385   :  { %1445 = vmatprep.subr.bf16.mxu0 %v1444_v31 }
 0x388   :  { %1447 = vmatpush3.bf16.msra.mxu0 %v1444_v31  ;;  %v1176_v31 = vld [vmem:[%s2070_s6] ss:$0 sm:$0xff] }
 0x389   :  { %1465 = vmatprep.subr.bf16.mxu0 %v1464_v59 }
 0x3df   :  { %v1304_v63 = vpop.f32.mrb[4].mxu0 }
 0x3e0   :  { %v523_v0 = vadd.f32 %v1304_v63, %v444_v60  ;;  %v517_v7 = vpop.f32.mrb[5].mxu0 }
 0x3e1   :  { %v518_v11 = vadd.f32 %v517_v7, %v443_v61 }
 0x3e2   :  { %1589 = vrcp.f32 %v523_v0 }
 0x3e3   :  { %1591 = vrcp.f32 %v518_v11  ;;  %v983_v11 = vld [vmem:[%s2072_s8 + $0x30] sm:$0xff] }
 0x3ec   :  { %v1590_v12 = vpop.eup %1589 }
 0x3ed   :  { %v1592_v15 = vpop.eup %1591  ;;  %v529_v17 = vmul.f32 %v1590_v12, %v1936_v62  ;;  %v984_v12 = vld [vmem:[%s2072_s8 + $0x38] sm:$0xff] }
 0x3ee   :  { %v528_v16 = vmul.f32 %v1592_v15, %v1933_v58  ;;  %v1492_v29 = vpack.c.bf16 %v984_v12, %v983_v11 }
 0x3f0   :  { %1321 = vmatprep.mubr.msk.f32.mxu0 %vm406_vm10, %v528_v16  ;;  %1340 = vmatprep.mubr.msk.f32.mxu1 %vm406_vm10, %v528_v16 }
 0x3f1   :  { %1322 = vmatmul.mubr.msk.f32.vlgmr.msra.gmra.mrb[6].mxu0 %vm406_vm10, %v529_v17  ;;  %1341 = vmatmul.mubr.msk.f32.vlgmr.msra.gmra.mrb[2].mxu1 %vm406_vm10, %v529_v17 }
 0x3f2   :  { %1467 = vmatpush3.bf16.msra.mxu0 %v1464_v59  ;;  %1483 = vmatpush3.bf16.msra.mxu1 %v1480_v8 }
 0x3f3   :  { %1469 = vmatprep.subr.bf16.mxu0 %v1468_v18  ;;  %1485 = vmatprep.subr.bf16.mxu1 %v1484_v10 }
 0x3f6   :  { %1471 = vmatpush3.bf16.msra.mxu0 %v1468_v18  ;;  %1487 = vmatpush3.bf16.msra.mxu1 %v1484_v10 }
 0x3f7   :  { %1489 = vmatprep.subr.bf16.mxu1 %v1488_v52 }
 0x3fa   :  { %1491 = vmatpush3.bf16.msra.mxu1 %v1488_v52 }
 0x3fb   :  { %1493 = vmatprep.subr.bf16.mxu1 %v1492_v29 }
 0x3fe   :  { %1495 = vmatpush3.bf16.msra.mxu1 %v1492_v29 }
 0x4c4   :  { %v1323_v19 = vpop.f32.mrb[6].mxu0  ;;  %v1342_v20 = vpop.f32.mrb[2].mxu1 }
 0x4c5   :  { %v743_v21 = vmul.f32 0.25, %v1342_v20  ;;  %v634_v22 = vpop.f32.mrb[7].mxu0  ;;  %v733_v24 = vpop.f32.mrb[3].mxu1 }
 0x4c6   :  { %v742_v26 = vmul.f32 0.25, %v733_v24  ;;  %1351 = vmatprep.mubr.msk.f32.mxu0 %vm70_vm0, %v634_v22 }
 0x4c7   :  { %746 = vst.msk [vmem:[%s2076_s12 + $0x8] sm:$0xff] %vm744_vm8, %v743_v21  ;;  %1352 = vmatmul.mubr.msk.f32.vlgmr.msra.gmra.mrb[8].mxu0 %vm70_vm0, %v1323_v19 }
 0x4c8   :  { %745 = vst.msk [vmem:[%s2076_s12] sm:$0xff] %vm744_vm8, %v742_v26 }
 0x59a   :  { %v1353_v28 = vpop.f32.mrb[8].mxu0 }
 0x59b   :  { %v836_v30 = vadd.f32 %v1353_v28, %v1172_v27  ;;  %v830_v32 = vpop.f32.mrb[9].mxu0 }
 0x59c   :  { %v831_v33 = vadd.f32 %v1172_v27, %v830_v32 }
 0x59d   :  { %v840_v5 = vadd.f32 %v836_v30, %v1819_v37 }
 0x59e   :  { %v839_v34 = vadd.f32 %v831_v33, %v1789_v23  ;;  %v886_v23 = vld [vmem:[#allocation2] sm:$0xff] }
 0x59f   :  { %v846_v36 = vsel %vm70_vm0, %v840_v5, 0.0  ;;  %v1472_v48 = vpack.c.bf16 %v887_v46, %v886_v23 }
 0x5a0   :  { %847 = vadd.xlane.f32.xlu1 %v846_v36  ;;  %v843_v38 = vsel %vm70_vm0, %v839_v34, 0.0 }
 0x5a1   :  { %844 = vadd.xlane.f32.xlu0 %v843_v38  ;;  %1473 = vmatprep.subr.bf16.mxu0 %v1472_v48 }
 0x5a2   :  { %1475 = vmatpush3.bf16.msra.mxu0 %v1472_v48 }
 0x5a3   :  { %1477 = vmatprep.subr.bf16.mxu0 %v1476_v49 }
 0x5a6   :  { %1479 = vmatpush3.bf16.msra.mxu0 %v1476_v49 }
 0x62d   :  { %v848_v39 = vpop.xlane.xlu1 %847 }
 0x62e   :  { %v851_v41 = vmul.f32 0.03125, %v848_v39  ;;  %v845_v42 = vpop.xlane.xlu0 %844 }
 0x62f   :  { %v850_v43 = vmul.f32 0.03125, %v845_v42 }
 0x630   :  { %v853_v44 = vsub.f32 %v840_v5, %v851_v41 }
 0x631   :  { %v852_v58 = vsub.f32 %v839_v34, %v850_v43 }
 0x632   :  { %v855_v45 = vmul.f32 %v853_v44, %v853_v44 }
 0x633   :  { %v854_v62 = vmul.f32 %v852_v58, %v852_v58 }
 0x634   :  { %v859_v37 = vsel %vm70_vm0, %v855_v45, 0.0 }
 0x635   :  { %v856_v25 = vsel %vm70_vm0, %v854_v62, 0.0 }
 0x636   :  { %857 = vadd.xlane.f32.xlu0 %v856_v25 }
 0x63a   :  { %860 = vadd.xlane.f32.xlu0 %v859_v37  ;;  %v1181_v37 = vld [vmem:[%s2073_s9] ss:$0 sm:$0xff] }
 0x6c3   :  { %v858_v53 = vpop.xlane.xlu0 %857 }
 0x6c4   :  { %v862_v54 = vmul.f32 0.03125, %v858_v53 }
 0x6c6   :  { %v864_v2 = vadd.f32 1e-05, %v862_v54 }
 0x6c7   :  { %v861_v55 = vpop.xlane.xlu0 %860 }
 0x6c8   :  { %1593 = vrsqrt.f32 %v864_v2  ;;  %v863_v40 = vmul.f32 0.03125, %v861_v55 }
 0x6ca   :  { %v865_v56 = vadd.f32 1e-05, %v863_v40 }
 0x6cc   :  { %1595 = vrsqrt.f32 %v865_v56 }
 0x6d2   :  { %v1594_v35 = vpop.eup %1593 }
 0x6d3   :  { %v868_v57 = vmul.f32 %v1594_v35, %v852_v58 }
 0x6d5   :  { %v876_v59 = vmul.f32 %v1175_v47, %v868_v57 }
 0x6d6   :  { %v1596_v60 = vpop.eup %1595 }
 0x6d7   :  { %v869_v61 = vmul.f32 %v1596_v60, %v853_v44  ;;  %v884_v63 = vadd.f32 %v1176_v31, %v876_v59 }
 0x6d9   :  { %v877_v0 = vmul.f32 %v1175_v47, %v869_v61  ;;  %1362 = vmatprep.mubr.msk.f32.mxu0 %vm70_vm0, %v884_v63 }
 0x6db   :  { %v885_v7 = vadd.f32 %v1176_v31, %v877_v0 }
 0x6dd   :  { %1363 = vmatmul.mubr.msk.f32.vlgmr.msra.gmra.mrb[10].mxu0 %vm70_vm0, %v885_v7 }
 0x7b0   :  { %v1364_v13 = vpop.f32.mrb[10].mxu0 }
 0x7b1   :  { %v974_v15 = vmul.f32 0.01, %v1364_v13  ;;  %v962_v16 = vpop.f32.mrb[11].mxu0  ;;  %vm972_vm9 = vcmp.ge.f32.partialorder %v1364_v13, 0.0 }
 0x7b2   :  { %vm971_vm11 = vcmp.ge.f32.partialorder %v962_v16, 0.0  ;;  %v973_v17 = vmul.f32 0.01, %v962_v16 }
 0x7b3   :  { %v976_v19 = vsel %vm972_vm9, %v1364_v13, %v974_v15 }
 0x7b4   :  { %v975_v18 = vsel %vm971_vm11, %v962_v16, %v973_v17 }
 0x7b5   :  { %1381 = vmatprep.mubr.msk.f32.mxu1 %vm406_vm10, %v975_v18 }
 0x7b6   :  { %1382 = vmatmul.mubr.msk.f32.vlgmr.msra.gmra.mrb[4].mxu1 %vm406_vm10, %v976_v19 }
 0x889   :  { %v1383_v20 = vpop.f32.mrb[4].mxu1 }
 0x88a   :  { %v1067_v21 = vadd.f32 %v1383_v20, %v885_v7  ;;  %v1057_v22 = vpop.f32.mrb[5].mxu1 }
 0x88b   :  { %v1066_v24 = vadd.f32 %v1057_v22, %v884_v63 }
 0x88c   :  { %v1073_v26 = vsel %vm70_vm0, %v1067_v21, 0.0 }
 0x88d   :  { %1074 = vadd.xlane.f32.xlu0 %v1073_v26  ;;  %v1070_v27 = vsel %vm70_vm0, %v1066_v24, 0.0 }
 0x88e   :  { %1071 = vadd.xlane.f32.xlu1 %v1070_v27 }
 0x91a   :  { %v1075_v28 = vpop.xlane.xlu0 %1074 }
 0x91b   :  { %v1077_v30 = vmul.f32 0.03125, %v1075_v28  ;;  %v1072_v32 = vpop.xlane.xlu1 %1071 }
 0x91c   :  { %v1076_v33 = vmul.f32 0.03125, %v1072_v32 }
 0x91d   :  { %v1079_v5 = vsub.f32 %v1067_v21, %v1077_v30 }
 0x91e   :  { %v1078_v34 = vsub.f32 %v1066_v24, %v1076_v33 }
 0x91f   :  { %v1081_v36 = vmul.f32 %v1079_v5, %v1079_v5 }
 0x920   :  { %v1080_v38 = vmul.f32 %v1078_v34, %v1078_v34 }
 0x921   :  { %v1085_v39 = vsel %vm70_vm0, %v1081_v36, 0.0 }
 0x922   :  { %1086 = vadd.xlane.f32.xlu0 %v1085_v39  ;;  %v1082_v41 = vsel %vm70_vm0, %v1080_v38, 0.0 }
 0x923   :  { %1083 = vadd.xlane.f32.xlu1 %v1082_v41 }
 0x9af   :  { %v1087_v42 = vpop.xlane.xlu0 %1086 }
 0x9b0   :  { %v1089_v43 = vmul.f32 0.03125, %v1087_v42  ;;  %v1084_v44 = vpop.xlane.xlu1 %1083 }
 0x9b1   :  { %v1088_v58 = vmul.f32 0.03125, %v1084_v44 }
 0x9b2   :  { %v1091_v62 = vadd.f32 1e-05, %v1089_v43 }
 0x9b3   :  { %v1090_v25 = vadd.f32 1e-05, %v1088_v58 }
 0x9b4   :  { %1597 = vrsqrt.f32 %v1091_v62 }
 0x9b5   :  { %1599 = vrsqrt.f32 %v1090_v25 }
 0x9be   :  { %v1598_v45 = vpop.eup %1597 }
 0x9bf   :  { %v1600_v23 = vpop.eup %1599  ;;  %v1095_v46 = vmul.f32 %v1598_v45, %v1079_v5 }
 0x9c0   :  { %v1094_v48 = vmul.f32 %v1600_v23, %v1078_v34 }
 0x9c1   :  { %v1103_v6 = vmul.f32 %v1181_v37, %v1095_v46 }
 0x9c2   :  { %v1102_v49 = vmul.f32 %v1181_v37, %v1094_v48 }
 0x9c3   :  { %v1111_v50 = vadd.f32 %v1182_v1, %v1103_v6 }
 0x9c4   :  { %v1110_v3 = vadd.f32 %v1182_v1, %v1102_v49 }
 0x9c5   :  { %1113 = vst.msk [vmem:[#allocation5 + $0x8] sm:$0xff] %vm70_vm0, %v1111_v50 }
 0x9c6   :  { %1112 = vst.msk [vmem:[#allocation5] sm:$0xff] %vm70_vm0, %v1110_v3 }
 0x9c7   :  { %1634 = shalt.err (!%p1631_p12)
}
 0x9c8   :  { %s1635_s12 = scalar_lea.hbm %s2075_s11, 256 }
 0x9c9   :  { %p1636_p13 = scmp.ne.s32.totalorder %s2075_s11, %s1635_s12  ;;  %p1639_p0 = scmp.lt.u32.totalorder %s1635_s12, %s2075_s11 }
 0x9cb   :  { %p1641_p1 = pnand %p1639_p0, %p1636_p13 }
 0x9cd   :  { %1644 = shalt.err (!%p1641_p1)
}
 0x9ce   :  { %1125 = dma.vmem_to_hbm [thread:$0]  %s1120_s28, 256, %s2075_s11, [#allocation4], %s1650_s13, %s1650_s13, %s1651_s14  }
 0x9cf   :  { %1647 = dma.done.wait [#allocation4], 256  }
 0x9d0   :  { %1648 = vsyncadd [#allocation4], 4294967040 }
 0x9d1   :  { %1133 = vsyncpa [#allocation3], 1 }
 0x9d2   :  { %1134 = vsyncpa [#allocation4], 1 }

</bundles_post_ra>
